<compile_context>
chip_gen: v7x
topology: tpu7x:2x2x1
jax: 0.10.0
libtpu: 0.0.40
codegen_flags: <defaults>
</compile_context>

<pallas_src>
import functools
import math

import jax
import jax.numpy as jnp
from jax.experimental import pallas as pl
from jax.experimental.pallas import tpu as pltpu

LOG_STEP = 7       # input / output feature dim (log_step in the PyTorch script)
F_PAD = 8          # feature dim padded to a full sublane group
N_HIDDEN = 32      # n_hidden_neurons
NUM_LAYERS = 8
LANE_CHUNK = 512   # in-kernel batch sub-tile (multiple of 128), register-resident


def _round_up(x, m):
    return ((x + m - 1) // m) * m


def _make_kernel(tb):
    """Build the kernel for a given (static) batch-tile width tb (multiple of 128)."""
    # static chunk boundaries along the lane (batch) axis of the tile
    chunks = []
    off = 0
    while off < tb:
        sz = min(LANE_CHUNK, tb - off)
        chunks.append((off, sz))
        off += sz

    def satnet_kernel(x_ref, w1_ref, wm_ref, wl_ref, bm_ref, bl_ref, o_ref):
        """All 8 layers for one batch tile, feature-major, bf16 matmuls / f32 accum.

        x_ref : (F_PAD, tb)              input tile (batch on lanes), f32
        w1_ref: (N_HIDDEN, F_PAD)        fc1 weight, bf16 (zero-padded input col)
        wm_ref: (6, N_HIDDEN, N_HIDDEN)  fc2..fc7 weights, bf16
        wl_ref: (F_PAD, N_HIDDEN)        fc8 weight, bf16 (zero-padded output row)
        bm_ref: (7, N_HIDDEN, 1)         fc1..fc7 biases, f32
        bl_ref: (F_PAD, 1)               fc8 bias, f32 (zero-padded)
        o_ref : (F_PAD, tb)              output tile, f32
        """
        # hoist the (tiny) weight/bias loads out of the per-chunk loop
        w1 = w1_ref[...]
        wl = wl_ref[...]
        wm = [wm_ref[l] for l in range(NUM_LAYERS - 2)]
        bm = [bm_ref[l] for l in range(NUM_LAYERS - 1)]
        bl = bl_ref[...]

        for off, sz in chunks:                       # static slices: zero runtime cost
            xc = x_ref[:, off:off + sz].astype(jnp.bfloat16)
            # layer 1: (32, 8) @ (8, sz) -> (32, sz), f32 accum
            h = jnp.dot(w1, xc, preferred_element_type=jnp.float32)
            h = jnp.maximum(h + bm[0], 0.0)
            # layers 2..7 (Linear + ReLU), bf16 MXU inputs
            for l in range(NUM_LAYERS - 2):
                h = jnp.dot(wm[l], h.astype(jnp.bfloat16),
                            preferred_element_type=jnp.float32)
                h = jnp.maximum(h + bm[l + 1], 0.0)
            # layer 8 (no activation): (8, 32) @ (32, sz) -> (8, sz)
            y = jnp.dot(wl, h.astype(jnp.bfloat16),
                        preferred_element_type=jnp.float32)
            o_ref[:, off:off + sz] = (y + bl).astype(o_ref.dtype)

    return satnet_kernel


@functools.partial(jax.jit, static_argnames=("tile_b",))
def satnet_forward(x, w1, w_mid, w_last, b_mid, b_last, *, tile_b=8192):
    """x: (B, LOG_STEP) float32 -> (B, LOG_STEP) float32 (PyTorch semantics)."""
    B, F = x.shape
    assert F == LOG_STEP

    # balanced tiling: round batch to a 128-lane multiple, then split into n
    # near-equal tiles (avoids up to tile_b-1 dead columns of padding).
    Bp0 = _round_up(max(B, 1), 128)
    n = pl.cdiv(Bp0, tile_b)
    if Bp0 >= 256:
        n = max(n, 2)                 # >=2 grid steps -> both v7x TensorCores busy
    tb = _round_up(pl.cdiv(Bp0, n), 128)
    Bp = n * tb

    # feature-major (F_PAD, Bp): batch on the 128-lane axis, features on sublanes.
    # NOTE: x.T here and the final .T are separate XLA transposes; feature-major
    # callers can skip both and call pallas directly with (F_PAD, Bp) data.
    x_t = x.T.astype(jnp.float32)                                  # (7, B)
    x_t = jnp.pad(x_t, ((0, F_PAD - LOG_STEP), (0, Bp - B)))       # (8, Bp)

    out_t = pl.pallas_call(
        _make_kernel(tb),
        out_shape=jax.ShapeDtypeStruct((F_PAD, Bp), jnp.float32),
        grid_spec=pltpu.PrefetchScalarGridSpec(
            num_scalar_prefetch=0,
            grid=(n,),
            in_specs=[
                pl.BlockSpec((F_PAD, tb), lambda i: (0, i)),       # x^T batch tile
                pl.BlockSpec(w1.shape, lambda i: (0, 0)),          # (32, 8) const
                pl.BlockSpec(w_mid.shape, lambda i: (0, 0, 0)),    # (6, 32, 32) const
                pl.BlockSpec(w_last.shape, lambda i: (0, 0)),      # (8, 32) const
                pl.BlockSpec(b_mid.shape, lambda i: (0, 0, 0)),    # (7, 32, 1) const
                pl.BlockSpec(b_last.shape, lambda i: (0, 0)),      # (8, 1) const
            ],
            out_specs=pl.BlockSpec((F_PAD, tb), lambda i: (0, i)),
        ),
        compiler_params=pltpu.CompilerParams(
            dimension_semantics=("parallel",)),
    )(x_t, w1, w_mid, w_last, b_mid, b_last)

    return out_t[:LOG_STEP, :B].T                                  # back to (B, 7)


def init_params(key, n_hidden=N_HIDDEN):
    """PyTorch-native (out_features, in_features) weights, nn.Linear default init."""
    dims = [(n_hidden, LOG_STEP)] + [(n_hidden, n_hidden)] * 6 + [(LOG_STEP, n_hidden)]
    params = []
    for (fan_out, fan_in) in dims:
        key, kw, kb = jax.random.split(key, 3)
        bound = 1.0 / math.sqrt(fan_in)
        w = jax.random.uniform(kw, (fan_out, fan_in), jnp.float32, -bound, bound)
        b = jax.random.uniform(kb, (fan_out,), jnp.float32, -bound, bound)
        params.append((w, b))
    return params


def pack_params(params):
    """Pack 8 PyTorch-layout layers into 6 kernel operands.

    w1     (32, 8)      bf16  fc1, input col zero-padded 7->8
    w_mid  (6, 32, 32)  bf16  fc2..fc7
    w_last (8, 32)      bf16  fc8, output rows zero-padded 7->8
    b_mid  (7, 32, 1)   f32   fc1..fc7 biases
    b_last (8, 1)       f32   fc8 bias, zero-padded
    """
    w1, b1 = params[0]
    w1p = jnp.zeros((N_HIDDEN, F_PAD), jnp.float32).at[:, :LOG_STEP].set(w1)
    w_mid = jnp.stack([params[i][0] for i in range(1, NUM_LAYERS - 1)])
    b_mid = jnp.stack([b1] + [params[i][1] for i in range(1, NUM_LAYERS - 1)])
    w8, b8 = params[NUM_LAYERS - 1]
    w_last = jnp.zeros((F_PAD, N_HIDDEN), jnp.float32).at[:LOG_STEP, :].set(w8)
    b_last = jnp.zeros((F_PAD,), jnp.float32).at[:LOG_STEP].set(b8)
    return (w1p.astype(jnp.bfloat16),
            w_mid.astype(jnp.bfloat16),
            w_last.astype(jnp.bfloat16),
            b_mid[:, :, None].astype(jnp.float32),
            b_last[:, None].astype(jnp.float32))


def satnet_reference(x, params):
    """Plain-JAX f32 reference (PyTorch semantics: y = x @ W.T + b)."""
    h = x
    for i, (w, b) in enumerate(params):
        h = h @ w.T + b
        if i < len(params) - 1:
            h = jnp.maximum(h, 0.0)
    return h


if __name__ == "__main__":
    key = jax.random.PRNGKey(0)
    kx, kp = jax.random.split(key)

    params = init_params(kp, N_HIDDEN)
    packed = pack_params(params)

    # small demo batch consistent with the module (log_step = 7 input features)
    batch = 8
    x = jax.random.normal(kx, (batch, LOG_STEP), jnp.float32)

    out = jax.block_until_ready(satnet_forward(x, *packed))
    ref = satnet_reference(x, params)
    assert out.shape == (batch, LOG_STEP)
    # bf16 matmul inputs -> loosened tolerances vs the f32 reference
    assert jnp.allclose(out, ref, atol=5e-2, rtol=5e-2), "mismatch vs reference (small batch)"

    # larger batch: exercises balanced multi-tile grid + in-kernel lane chunking
    xb = jax.random.normal(jax.random.PRNGKey(1), (5000, LOG_STEP), jnp.float32)
    outb = jax.block_until_ready(satnet_forward(xb, *packed, tile_b=8192))
    refb = satnet_reference(xb, params)
    assert outb.shape == (5000, LOG_STEP)
    assert jnp.allclose(outb, refb, atol=5e-2, rtol=5e-2), "mismatch vs reference (large batch)"

    print("KERNEL_OK")
</pallas_src>

<mosaic_0001>
module attributes {stable_mosaic.version = 11 : i64} {
  func.func @satnet_kernel(%arg0: i32, %arg1: memref<8x128xf32, #tpu.memory_space<vmem>>, %arg2: memref<32x8xbf16, #tpu.memory_space<vmem>>, %arg3: memref<6x32x32xbf16, #tpu.memory_space<vmem>>, %arg4: memref<8x32xbf16, #tpu.memory_space<vmem>>, %arg5: memref<7x32x1xf32, #tpu.memory_space<vmem>>, %arg6: memref<8x1xf32, #tpu.memory_space<vmem>>, %arg7: memref<8x128xf32, #tpu.memory_space<vmem>>) attributes {dimension_semantics = [#tpu.dimension_semantics<parallel>], iteration_bounds = array<i64: 1>, scalar_prefetch = 0 : i64, scratch_operands = 0 : i64, tpu.core_type = #tpu.core_type<tc>, window_params = [{transform_indices = @transform_0, window_bounds = array<i64: 8, 128>}, {pipeline_mode = #tpu.pipeline_mode<synchronous>, transform_indices = @transform_1, window_bounds = array<i64: 32, 8>}, {pipeline_mode = #tpu.pipeline_mode<synchronous>, transform_indices = @transform_2, window_bounds = array<i64: 6, 32, 32>}, {pipeline_mode = #tpu.pipeline_mode<synchronous>, transform_indices = @transform_3, window_bounds = array<i64: 8, 32>}, {pipeline_mode = #tpu.pipeline_mode<synchronous>, transform_indices = @transform_4, window_bounds = array<i64: 7, 32, 1>}, {pipeline_mode = #tpu.pipeline_mode<synchronous>, transform_indices = @transform_5, window_bounds = array<i64: 8, 1>}, {transform_indices = @transform_6, window_bounds = array<i64: 8, 128>}]} {
    %c0 = arith.constant 0 : index
    %c0_0 = arith.constant 0 : index
    %0 = vector.load %arg2[%c0, %c0_0] : memref<32x8xbf16, #tpu.memory_space<vmem>>, vector<32x8xbf16>
    %c0_1 = arith.constant 0 : index
    %c0_2 = arith.constant 0 : index
    %1 = vector.load %arg4[%c0_1, %c0_2] : memref<8x32xbf16, #tpu.memory_space<vmem>>, vector<8x32xbf16>
    %c0_3 = arith.constant 0 : index
    %c0_4 = arith.constant 0 : index
    %c0_5 = arith.constant 0 : index
    %2 = vector.load %arg3[%c0_3, %c0_4, %c0_5] : memref<6x32x32xbf16, #tpu.memory_space<vmem>>, vector<1x32x32xbf16>
    %3 = vector.shape_cast %2 : vector<1x32x32xbf16> to vector<32x32xbf16>
    %c1 = arith.constant 1 : index
    %c0_6 = arith.constant 0 : index
    %c0_7 = arith.constant 0 : index
    %4 = vector.load %arg3[%c1, %c0_6, %c0_7] : memref<6x32x32xbf16, #tpu.memory_space<vmem>>, vector<1x32x32xbf16>
    %5 = vector.shape_cast %4 : vector<1x32x32xbf16> to vector<32x32xbf16>
    %c2 = arith.constant 2 : index
    %c0_8 = arith.constant 0 : index
    %c0_9 = arith.constant 0 : index
    %6 = vector.load %arg3[%c2, %c0_8, %c0_9] : memref<6x32x32xbf16, #tpu.memory_space<vmem>>, vector<1x32x32xbf16>
    %7 = vector.shape_cast %6 : vector<1x32x32xbf16> to vector<32x32xbf16>
    %c3 = arith.constant 3 : index
    %c0_10 = arith.constant 0 : index
    %c0_11 = arith.constant 0 : index
    %8 = vector.load %arg3[%c3, %c0_10, %c0_11] : memref<6x32x32xbf16, #tpu.memory_space<vmem>>, vector<1x32x32xbf16>
    %9 = vector.shape_cast %8 : vector<1x32x32xbf16> to vector<32x32xbf16>
    %c4 = arith.constant 4 : index
    %c0_12 = arith.constant 0 : index
    %c0_13 = arith.constant 0 : index
    %10 = vector.load %arg3[%c4, %c0_12, %c0_13] : memref<6x32x32xbf16, #tpu.memory_space<vmem>>, vector<1x32x32xbf16>
    %11 = vector.shape_cast %10 : vector<1x32x32xbf16> to vector<32x32xbf16>
    %c5 = arith.constant 5 : index
    %c0_14 = arith.constant 0 : index
    %c0_15 = arith.constant 0 : index
    %12 = vector.load %arg3[%c5, %c0_14, %c0_15] : memref<6x32x32xbf16, #tpu.memory_space<vmem>>, vector<1x32x32xbf16>
    %13 = vector.shape_cast %12 : vector<1x32x32xbf16> to vector<32x32xbf16>
    %c0_16 = arith.constant 0 : index
    %c0_17 = arith.constant 0 : index
    %c0_18 = arith.constant 0 : index
    %14 = vector.load %arg5[%c0_16, %c0_17, %c0_18] : memref<7x32x1xf32, #tpu.memory_space<vmem>>, vector<1x32x1xf32>
    %15 = vector.shape_cast %14 : vector<1x32x1xf32> to vector<32x1xf32>
    %c1_19 = arith.constant 1 : index
    %c0_20 = arith.constant 0 : index
    %c0_21 = arith.constant 0 : index
    %16 = vector.load %arg5[%c1_19, %c0_20, %c0_21] : memref<7x32x1xf32, #tpu.memory_space<vmem>>, vector<1x32x1xf32>
    %17 = vector.shape_cast %16 : vector<1x32x1xf32> to vector<32x1xf32>
    %c2_22 = arith.constant 2 : index
    %c0_23 = arith.constant 0 : index
    %c0_24 = arith.constant 0 : index
    %18 = vector.load %arg5[%c2_22, %c0_23, %c0_24] : memref<7x32x1xf32, #tpu.memory_space<vmem>>, vector<1x32x1xf32>
    %19 = vector.shape_cast %18 : vector<1x32x1xf32> to vector<32x1xf32>
    %c3_25 = arith.constant 3 : index
    %c0_26 = arith.constant 0 : index
    %c0_27 = arith.constant 0 : index
    %20 = vector.load %arg5[%c3_25, %c0_26, %c0_27] : memref<7x32x1xf32, #tpu.memory_space<vmem>>, vector<1x32x1xf32>
    %21 = vector.shape_cast %20 : vector<1x32x1xf32> to vector<32x1xf32>
    %c4_28 = arith.constant 4 : index
    %c0_29 = arith.constant 0 : index
    %c0_30 = arith.constant 0 : index
    %22 = vector.load %arg5[%c4_28, %c0_29, %c0_30] : memref<7x32x1xf32, #tpu.memory_space<vmem>>, vector<1x32x1xf32>
    %23 = vector.shape_cast %22 : vector<1x32x1xf32> to vector<32x1xf32>
    %c5_31 = arith.constant 5 : index
    %c0_32 = arith.constant 0 : index
    %c0_33 = arith.constant 0 : index
    %24 = vector.load %arg5[%c5_31, %c0_32, %c0_33] : memref<7x32x1xf32, #tpu.memory_space<vmem>>, vector<1x32x1xf32>
    %25 = vector.shape_cast %24 : vector<1x32x1xf32> to vector<32x1xf32>
    %c6 = arith.constant 6 : index
    %c0_34 = arith.constant 0 : index
    %c0_35 = arith.constant 0 : index
    %26 = vector.load %arg5[%c6, %c0_34, %c0_35] : memref<7x32x1xf32, #tpu.memory_space<vmem>>, vector<1x32x1xf32>
    %27 = vector.shape_cast %26 : vector<1x32x1xf32> to vector<32x1xf32>
    %c0_36 = arith.constant 0 : index
    %c0_37 = arith.constant 0 : index
    %28 = vector.load %arg6[%c0_36, %c0_37] : memref<8x1xf32, #tpu.memory_space<vmem>>, vector<8x1xf32>
    %c0_38 = arith.constant 0 : index
    %c0_39 = arith.constant 0 : index
    %29 = vector.load %arg1[%c0_38, %c0_39] : memref<8x128xf32, #tpu.memory_space<vmem>>, vector<8x128xf32>
    %30 = arith.truncf %29 : vector<8x128xf32> to vector<8x128xbf16>
    %cst = arith.constant dense<0.000000e+00> : vector<32x128xf32>
    %31 = tpu.matmul %0, %30, %cst {dimension_numbers = #tpu.dot_dimension_numbers<[1], [0], [0], [1], [0, 0, 1, 1], [], []>} : vector<32x8xbf16>, vector<8x128xbf16>, vector<32x128xf32> -> vector<32x128xf32>
    %32 = vector.broadcast %15 : vector<32x1xf32> to vector<32x128xf32>
    %33 = arith.addf %31, %32 : vector<32x128xf32>
    %cst_40 = arith.constant 0.000000e+00 : f32
    %34 = vector.broadcast %cst_40 : f32 to vector<32x128xf32>
    %35 = arith.maximumf %33, %34 : vector<32x128xf32>
    %36 = arith.truncf %35 : vector<32x128xf32> to vector<32x128xbf16>
    %cst_41 = arith.constant dense<0.000000e+00> : vector<32x128xf32>
    %37 = tpu.matmul %3, %36, %cst_41 {dimension_numbers = #tpu.dot_dimension_numbers<[1], [0], [0], [1], [0, 0, 1, 1], [], []>} : vector<32x32xbf16>, vector<32x128xbf16>, vector<32x128xf32> -> vector<32x128xf32>
    %38 = vector.broadcast %17 : vector<32x1xf32> to vector<32x128xf32>
    %39 = arith.addf %37, %38 : vector<32x128xf32>
    %cst_42 = arith.constant 0.000000e+00 : f32
    %40 = vector.broadcast %cst_42 : f32 to vector<32x128xf32>
    %41 = arith.maximumf %39, %40 : vector<32x128xf32>
    %42 = arith.truncf %41 : vector<32x128xf32> to vector<32x128xbf16>
    %cst_43 = arith.constant dense<0.000000e+00> : vector<32x128xf32>
    %43 = tpu.matmul %5, %42, %cst_43 {dimension_numbers = #tpu.dot_dimension_numbers<[1], [0], [0], [1], [0, 0, 1, 1], [], []>} : vector<32x32xbf16>, vector<32x128xbf16>, vector<32x128xf32> -> vector<32x128xf32>
    %44 = vector.broadcast %19 : vector<32x1xf32> to vector<32x128xf32>
    %45 = arith.addf %43, %44 : vector<32x128xf32>
    %cst_44 = arith.constant 0.000000e+00 : f32
    %46 = vector.broadcast %cst_44 : f32 to vector<32x128xf32>
    %47 = arith.maximumf %45, %46 : vector<32x128xf32>
    %48 = arith.truncf %47 : vector<32x128xf32> to vector<32x128xbf16>
    %cst_45 = arith.constant dense<0.000000e+00> : vector<32x128xf32>
    %49 = tpu.matmul %7, %48, %cst_45 {dimension_numbers = #tpu.dot_dimension_numbers<[1], [0], [0], [1], [0, 0, 1, 1], [], []>} : vector<32x32xbf16>, vector<32x128xbf16>, vector<32x128xf32> -> vector<32x128xf32>
    %50 = vector.broadcast %21 : vector<32x1xf32> to vector<32x128xf32>
    %51 = arith.addf %49, %50 : vector<32x128xf32>
    %cst_46 = arith.constant 0.000000e+00 : f32
    %52 = vector.broadcast %cst_46 : f32 to vector<32x128xf32>
    %53 = arith.maximumf %51, %52 : vector<32x128xf32>
    %54 = arith.truncf %53 : vector<32x128xf32> to vector<32x128xbf16>
    %cst_47 = arith.constant dense<0.000000e+00> : vector<32x128xf32>
    %55 = tpu.matmul %9, %54, %cst_47 {dimension_numbers = #tpu.dot_dimension_numbers<[1], [0], [0], [1], [0, 0, 1, 1], [], []>} : vector<32x32xbf16>, vector<32x128xbf16>, vector<32x128xf32> -> vector<32x128xf32>
    %56 = vector.broadcast %23 : vector<32x1xf32> to vector<32x128xf32>
    %57 = arith.addf %55, %56 : vector<32x128xf32>
    %cst_48 = arith.constant 0.000000e+00 : f32
    %58 = vector.broadcast %cst_48 : f32 to vector<32x128xf32>
    %59 = arith.maximumf %57, %58 : vector<32x128xf32>
    %60 = arith.truncf %59 : vector<32x128xf32> to vector<32x128xbf16>
    %cst_49 = arith.constant dense<0.000000e+00> : vector<32x128xf32>
    %61 = tpu.matmul %11, %60, %cst_49 {dimension_numbers = #tpu.dot_dimension_numbers<[1], [0], [0], [1], [0, 0, 1, 1], [], []>} : vector<32x32xbf16>, vector<32x128xbf16>, vector<32x128xf32> -> vector<32x128xf32>
    %62 = vector.broadcast %25 : vector<32x1xf32> to vector<32x128xf32>
    %63 = arith.addf %61, %62 : vector<32x128xf32>
    %cst_50 = arith.constant 0.000000e+00 : f32
    %64 = vector.broadcast %cst_50 : f32 to vector<32x128xf32>
    %65 = arith.maximumf %63, %64 : vector<32x128xf32>
    %66 = arith.truncf %65 : vector<32x128xf32> to vector<32x128xbf16>
    %cst_51 = arith.constant dense<0.000000e+00> : vector<32x128xf32>
    %67 = tpu.matmul %13, %66, %cst_51 {dimension_numbers = #tpu.dot_dimension_numbers<[1], [0], [0], [1], [0, 0, 1, 1], [], []>} : vector<32x32xbf16>, vector<32x128xbf16>, vector<32x128xf32> -> vector<32x128xf32>
    %68 = vector.broadcast %27 : vector<32x1xf32> to vector<32x128xf32>
    %69 = arith.addf %67, %68 : vector<32x128xf32>
    %cst_52 = arith.constant 0.000000e+00 : f32
    %70 = vector.broadcast %cst_52 : f32 to vector<32x128xf32>
    %71 = arith.maximumf %69, %70 : vector<32x128xf32>
    %72 = arith.truncf %71 : vector<32x128xf32> to vector<32x128xbf16>
    %cst_53 = arith.constant dense<0.000000e+00> : vector<8x128xf32>
    %73 = tpu.matmul %1, %72, %cst_53 {dimension_numbers = #tpu.dot_dimension_numbers<[1], [0], [0], [1], [0, 0, 1, 1], [], []>} : vector<8x32xbf16>, vector<32x128xbf16>, vector<8x128xf32> -> vector<8x128xf32>
    %74 = vector.broadcast %28 : vector<8x1xf32> to vector<8x128xf32>
    %75 = arith.addf %73, %74 : vector<8x128xf32>
    %c0_54 = arith.constant 0 : index
    %c0_55 = arith.constant 0 : index
    %76 = vector.load %arg7[%c0_54, %c0_55] : memref<8x128xf32, #tpu.memory_space<vmem>>, vector<8x128xf32>
    tpu.vector_store %arg7[%c0_54, %c0_55], %75 {strides = array<i32>} : memref<8x128xf32, #tpu.memory_space<vmem>>, vector<8x128xf32>,
    return
  }
  func.func @transform_0(%arg0: i32) -> (i32, i32) {
    %c0_i32 = arith.constant 0 : i32
    %c0_i32_0 = arith.constant 0 : i32
    return %c0_i32, %arg0 : i32, i32
  }
  func.func @transform_1(%arg0: i32) -> (i32, i32) {
    %c0_i32 = arith.constant 0 : i32
    %c0_i32_0 = arith.constant 0 : i32
    %c0_i32_1 = arith.constant 0 : i32
    return %c0_i32, %c0_i32_0 : i32, i32
  }
  func.func @transform_2(%arg0: i32) -> (i32, i32, i32) {
    %c0_i32 = arith.constant 0 : i32
    %c0_i32_0 = arith.constant 0 : i32
    %c0_i32_1 = arith.constant 0 : i32
    %c0_i32_2 = arith.constant 0 : i32
    return %c0_i32, %c0_i32_0, %c0_i32_1 : i32, i32, i32
  }
  func.func @transform_3(%arg0: i32) -> (i32, i32) {
    %c0_i32 = arith.constant 0 : i32
    %c0_i32_0 = arith.constant 0 : i32
    %c0_i32_1 = arith.constant 0 : i32
    return %c0_i32, %c0_i32_0 : i32, i32
  }
  func.func @transform_4(%arg0: i32) -> (i32, i32, i32) {
    %c0_i32 = arith.constant 0 : i32
    %c0_i32_0 = arith.constant 0 : i32
    %c0_i32_1 = arith.constant 0 : i32
    %c0_i32_2 = arith.constant 0 : i32
    return %c0_i32, %c0_i32_0, %c0_i32_1 : i32, i32, i32
  }
  func.func @transform_5(%arg0: i32) -> (i32, i32) {
    %c0_i32 = arith.constant 0 : i32
    %c0_i32_0 = arith.constant 0 : i32
    %c0_i32_1 = arith.constant 0 : i32
    return %c0_i32, %c0_i32_0 : i32, i32
  }
  func.func @transform_6(%arg0: i32) -> (i32, i32) {
    %c0_i32 = arith.constant 0 : i32
    %c0_i32_0 = arith.constant 0 : i32
    return %c0_i32, %arg0 : i32, i32
  }
}

</mosaic_0001>

<bundles_post_ra>
// kernel: satnet_forward.1
= control target key start
LH: loop header
LB: loop body
LE: loop exit
PB: predicated region body
PF: predicated region fallthrough
CT: control target
= control target key end

     0   :  { %vm132_vm0 = vcmask 1043456   ;;  %vm125_vm1 = vcmask 64512   ;;  %v976_v1 = vmov 0   ;;  %vm221_vm2 = vcmask 261120   ;;  %s1167_s0 = inlined_call_operand.vmem [shape: f32[8,128], index: 0, kind: input, shape index: {}]   ;;  %s1168_s1 = inlined_call_operand.vmem [shape: bf16[32,8], index: 1, kind: input, shape index: {}]   ;;  %s1169_s4 = inlined_call_operand.vmem [shape: f32[7,32,1], index: 4, kind: input, shape index: {}]   ;;  %s1170_s5 = inlined_call_operand.vmem [shape: f32[8,1], index: 5, kind: input, shape index: {}]   ;;  %s1171_s2 = inlined_call_operand.vmem [shape: bf16[6,32,32], index: 2, kind: input, shape index: {}]   ;;  %s1172_s3 = inlined_call_operand.vmem [shape: bf16[8,32], index: 3, kind: input, shape index: {}]   ;;  %s1173_s6 = inlined_call_operand.vmem [shape: f32[8,128], index: 6, kind: output, shape index: {}]  }
   0x1   :  { %v93_v0 = vld [vmem:[%s1167_s0] sm:$0xff]  ;;  %960 = vset.pattern.permute.xlu0 %v976_v1  ;;  %961 = vset.pattern.permute.xlu1 %v976_v1  ;;  %v963_v6 = vld [vmem:[%s1168_s1 + $0x8] sm:$0xff]   ;;  %v60_v7 = vld [vmem:[%s1169_s4 + $0x10] sm:$0xff]  ;;  %vm978_vm3 = vmmov 0  }
   0x2   :  { %v94_v2 = vpack.c.bf16 %v93_v0, %v93_v0  ;;  %v962_v3 = vld [vmem:[%s1168_s1] sm:$0xff]   ;;  %v59_v8 = vld [vmem:[%s1169_s4 + $0x8] sm:$0xff]  ;;  %107 = vperm.xlu1 %961, %v60_v7   ;;  %v61_v9 = vld [vmem:[%s1169_s4 + $0x18] sm:$0xff] }
   0x3   :  { %v58_v4 = vld [vmem:[%s1169_s4] sm:$0xff]  ;;  %896 = vmatprep.mubr.msk.bf16.mxu0 %vm125_vm1, %v962_v3  ;;  %v812_v11 = vld [vmem:[%s1169_s4 + $0x28] sm:$0xff]  ;;  %v813_v12 = vld [vmem:[%s1169_s4 + $0x30] sm:$0xff] }
   0x4   :  { %956 = vmatprep.subr.msk.bf16.mxu0 %vm132_vm0, %v94_v2  ;;  %v134_v5 = vsel %vm132_vm0, %v94_v2, 0  ;;  %97 = vperm.xlu0 %960, %v58_v4   ;;  %v811_v10 = vld [vmem:[%s1169_s4 + $0x20] sm:$0xff]  ;;  %v814_v13 = vld [vmem:[%s1169_s4 + $0x38] sm:$0xff]  ;;  %v816_v15 = vld [vmem:[%s1169_s4 + $0x48] sm:$0xff] }
   0x5   :  { %895 = vmatpush3.bf16.msra.mxu0 %v134_v5  ;;  %v815_v14 = vld [vmem:[%s1169_s4 + $0x40] sm:$0xff]  ;;  %v817_v16 = vld [vmem:[%s1169_s4 + $0x50] sm:$0xff]  ;;  %v818_v17 = vld [vmem:[%s1169_s4 + $0x58] sm:$0xff] }
   0x6   :  { %112 = vperm.xlu1 %961, %v61_v9   ;;  %v819_v18 = vld [vmem:[%s1169_s4 + $0x60] sm:$0xff]  ;;  %v820_v19 = vld [vmem:[%s1169_s4 + $0x68] sm:$0xff]  ;;  %v821_v20 = vld [vmem:[%s1169_s4 + $0x70] sm:$0xff] }
   0x7   :  { %v822_v21 = vld [vmem:[%s1169_s4 + $0x78] sm:$0xff]  ;;  %v823_v22 = vld [vmem:[%s1169_s4 + $0x80] sm:$0xff]  ;;  %v824_v23 = vld [vmem:[%s1169_s4 + $0x88] sm:$0xff] }
   0x8   :  { %897 = vmatmul.mubr.msk.bf16.vlgmr.msra.gmra.mrb[0].mxu0 %vm125_vm1, %v963_v6  ;;  %102 = vperm.xlu0 %960, %v59_v8   ;;  %v825_v24 = vld [vmem:[%s1169_s4 + $0x90] sm:$0xff]  ;;  %v826_v25 = vld [vmem:[%s1169_s4 + $0x98] sm:$0xff]  ;;  %v827_v26 = vld [vmem:[%s1169_s4 + $0xa0] sm:$0xff] }
   0x9   :  { %v828_v27 = vld [vmem:[%s1169_s4 + $0xa8] sm:$0xff]  ;;  %v829_v28 = vld [vmem:[%s1169_s4 + $0xb0] sm:$0xff]  ;;  %v830_v29 = vld [vmem:[%s1169_s4 + $0xb8] sm:$0xff] }
   0xa   :  { %198 = vperm.xlu1 %961, %v812_v11   ;;  %v831_v30 = vld [vmem:[%s1169_s4 + $0xc0] sm:$0xff]  ;;  %v832_v31 = vld [vmem:[%s1169_s4 + $0xc8] sm:$0xff]  ;;  %v833_v32 = vld [vmem:[%s1169_s4 + $0xd0] sm:$0xff] }
   0xb   :  { %v834_v33 = vld [vmem:[%s1169_s4 + $0xd8] sm:$0xff]  ;;  %v92_v34 = vld [vmem:[%s1170_s5] sm:$0xff]  ;;  %v965_v54 = vld [vmem:[%s1171_s2 + $0x8] sm:$0xff]  }
   0xc   :  { %193 = vperm.xlu0 %960, %v811_v10   ;;  %v964_v35 = vld [vmem:[%s1171_s2] sm:$0xff]   ;;  %v966_v55 = vld [vmem:[%s1171_s2 + $0x10] sm:$0xff]   ;;  %v967_v10 = vld [vmem:[%s1171_s2 + $0x18] sm:$0xff]  }
   0xd   :  { %904 = vmatprep.mubr.msk.bf16.mxu1 %vm221_vm2, %v964_v35  ;;  %912 = vmatprep.mubr.msk.bf16.mxu0 %vm221_vm2, %v966_v55  ;;  %v968_v11 = vld [vmem:[%s1171_s2 + $0x20] sm:$0xff]  }
   0xe   :  { %208 = vperm.xlu1 %961, %v814_v13  }
  0x10   :  { %203 = vperm.xlu0 %960, %v813_v12  }
  0x12   :  { %290 = vperm.xlu1 %961, %v816_v15  }
  0x14   :  { %285 = vperm.xlu0 %960, %v815_v14  }
  0x16   :  { %300 = vperm.xlu1 %961, %v818_v17  }
  0x18   :  { %295 = vperm.xlu0 %960, %v817_v16  }
  0x1a   :  { %381 = vperm.xlu1 %961, %v820_v19  }
  0x1c   :  { %376 = vperm.xlu0 %960, %v819_v18  }
  0x1e   :  { %391 = vperm.xlu1 %961, %v822_v21  }
  0x20   :  { %386 = vperm.xlu0 %960, %v821_v20  }
  0x22   :  { %472 = vperm.xlu1 %961, %v824_v23  }
  0x24   :  { %467 = vperm.xlu0 %960, %v823_v22  }
  0x26   :  { %482 = vperm.xlu1 %961, %v826_v25  }
  0x28   :  { %477 = vperm.xlu0 %960, %v825_v24  }
  0x2a   :  { %563 = vperm.xlu1 %961, %v828_v27  }
  0x2c   :  { %558 = vperm.xlu0 %960, %v827_v26  }
  0x2e   :  { %573 = vperm.xlu1 %961, %v830_v29  }
  0x30   :  { %568 = vperm.xlu0 %960, %v829_v28  }
  0x32   :  { %654 = vperm.xlu1 %961, %v832_v31   ;;  %v970_v31 = vld [vmem:[%s1171_s2 + $0x30] sm:$0xff]  }
  0x34   :  { %649 = vperm.xlu0 %960, %v831_v30   ;;  %v969_v30 = vld [vmem:[%s1171_s2 + $0x28] sm:$0xff]  }
  0x36   :  { %664 = vperm.xlu1 %961, %v834_v33  }
  0x38   :  { %659 = vperm.xlu0 %960, %v833_v32  }
  0x3c   :  { %740 = vperm.xlu0 %960, %v92_v34  }
  0x81   :  { %v108_v36 = vpop.permute.xlu1 %107 }
  0x83   :  { %v98_v37 = vpop.permute.xlu0 %97 }
  0x85   :  { %v113_v41 = vpop.permute.xlu1 %112 }
  0x87   :  { %v103_v44 = vpop.permute.xlu0 %102 }
  0x89   :  { %v199_v57 = vpop.permute.xlu1 %198 }
  0x8b   :  { %v194_v56 = vpop.permute.xlu0 %193 }
  0x8d   :  { %v209_v62 = vpop.permute.xlu1 %208 }
  0x8f   :  { %v204_v58 = vpop.permute.xlu0 %203 }
  0x91   :  { %v291_v13 = vpop.permute.xlu1 %290 }
  0x93   :  { %v286_v12 = vpop.permute.xlu0 %285 }
  0x95   :  { %v301_v18 = vpop.permute.xlu1 %300 }
  0x97   :  { %v296_v14 = vpop.permute.xlu0 %295 }
  0x99   :  { %v382_v33 = vpop.permute.xlu1 %381 }
  0x9b   :  { %v377_v32 = vpop.permute.xlu0 %376 }
  0x9f   :  { %v387_v34 = vpop.permute.xlu0 %386 }
  0xdb   :  { %v898_v38 = vpop.f32.mrb[0].mxu0 }
  0xdc   :  { %v179_v39 = vadd.f32 %v898_v38, %v108_v36  ;;  %v170_v40 = vpop.f32.mrb[1].mxu0  ;;  %v392_v38 = vpop.permute.xlu1 %391 }
  0xdd   :  { %v171_v42 = vadd.f32 %v170_v40, %v98_v37  ;;  %v899_v43 = vpop.f32.mrb[2].mxu0 }
  0xde   :  { %v182_v45 = vadd.f32 %v899_v43, %v113_v41  ;;  %v173_v46 = vpop.f32.mrb[3].mxu0  ;;  %v187_v48 = vmax.f32 %v179_v39, 0.0 }
  0xdf   :  { %v174_v47 = vadd.f32 %v173_v46, %v103_v44  ;;  %v185_v50 = vmax.f32 %v171_v42, 0.0 }
  0xe0   :  { %v188_v49 = vmax.f32 %v182_v45, 0.0 }
  0xe1   :  { %v186_v51 = vmax.f32 %v174_v47, 0.0 }
  0xe2   :  { %v190_v52 = vpack.c.bf16 %v188_v49, %v187_v48 }
  0xe3   :  { %v189_v53 = vpack.c.bf16 %v186_v51, %v185_v50  ;;  %v971_v50 = vld [vmem:[%s1171_s2 + $0x38] sm:$0xff]   ;;  %v972_v51 = vld [vmem:[%s1171_s2 + $0x40] sm:$0xff]  }
  0xe5   :  { %900 = vmatprep.subr.bf16.mxu1 %v189_v53 }
  0xe6   :  { %901 = vmatpush3.bf16.msra.mxu1 %v189_v53  ;;  %v473_v53 = vpop.permute.xlu1 %472 }
  0xe7   :  { %902 = vmatprep.subr.bf16.mxu1 %v190_v52 }
  0xea   :  { %903 = vmatpush3.bf16.msra.mxu1 %v190_v52  ;;  %v468_v52 = vpop.permute.xlu0 %467 }
  0xed   :  { %905 = vmatmul.mubr.msk.bf16.vlgmr.msra.gmra.mrb[0].mxu1 %vm221_vm2, %v965_v54 }
  0xee   :  { %920 = vmatprep.mubr.msk.bf16.mxu1 %vm221_vm2, %v968_v11  ;;  %v478_v54 = vpop.permute.xlu0 %477 }
 0x1c0   :  { %v906_v59 = vpop.f32.mrb[0].mxu1 }
 0x1c1   :  { %v271_v60 = vadd.f32 %v906_v59, %v204_v58  ;;  %v262_v61 = vpop.f32.mrb[1].mxu1  ;;  %v483_v58 = vpop.permute.xlu1 %482 }
 0x1c2   :  { %v263_v63 = vadd.f32 %v262_v61, %v194_v56  ;;  %v907_v0 = vpop.f32.mrb[2].mxu1 }
 0x1c3   :  { %v274_v1 = vadd.f32 %v907_v0, %v209_v62  ;;  %v265_v2 = vpop.f32.mrb[3].mxu1  ;;  %v279_v4 = vmax.f32 %v271_v60, 0.0 }
 0x1c4   :  { %v266_v3 = vadd.f32 %v265_v2, %v199_v57  ;;  %v277_v6 = vmax.f32 %v263_v63, 0.0 }
 0x1c5   :  { %v280_v5 = vmax.f32 %v274_v1, 0.0 }
 0x1c6   :  { %v278_v7 = vmax.f32 %v266_v3, 0.0 }
 0x1c7   :  { %v282_v8 = vpack.c.bf16 %v280_v5, %v279_v4 }
 0x1c8   :  { %v281_v9 = vpack.c.bf16 %v278_v7, %v277_v6  ;;  %v973_v6 = vld [vmem:[%s1171_s2 + $0x48] sm:$0xff]   ;;  %v974_v7 = vld [vmem:[%s1171_s2 + $0x50] sm:$0xff]  }
 0x1ca   :  { %908 = vmatprep.subr.bf16.mxu0 %v281_v9 }
 0x1cb   :  { %909 = vmatpush3.bf16.msra.mxu0 %v281_v9  ;;  %v564_v9 = vpop.permute.xlu1 %563 }
 0x1cc   :  { %910 = vmatprep.subr.bf16.mxu0 %v282_v8 }
 0x1cf   :  { %911 = vmatpush3.bf16.msra.mxu0 %v282_v8  ;;  %v559_v8 = vpop.permute.xlu0 %558 }
 0x1d2   :  { %913 = vmatmul.mubr.msk.bf16.vlgmr.msra.gmra.mrb[4].mxu0 %vm221_vm2, %v967_v10 }
 0x1d3   :  { %928 = vmatprep.mubr.msk.bf16.mxu0 %vm221_vm2, %v970_v31  ;;  %v569_v10 = vpop.permute.xlu0 %568 }
 0x2a5   :  { %v914_v15 = vpop.f32.mrb[4].mxu0 }
 0x2a6   :  { %v362_v16 = vadd.f32 %v914_v15, %v296_v14  ;;  %v353_v17 = vpop.f32.mrb[5].mxu0  ;;  %v574_v14 = vpop.permute.xlu1 %573 }
 0x2a7   :  { %v354_v19 = vadd.f32 %v353_v17, %v286_v12  ;;  %v915_v20 = vpop.f32.mrb[6].mxu0 }
 0x2a8   :  { %v365_v21 = vadd.f32 %v915_v20, %v301_v18  ;;  %v356_v22 = vpop.f32.mrb[7].mxu0  ;;  %v370_v24 = vmax.f32 %v362_v16, 0.0 }
 0x2a9   :  { %v357_v23 = vadd.f32 %v356_v22, %v291_v13  ;;  %v368_v26 = vmax.f32 %v354_v19, 0.0 }
 0x2aa   :  { %v371_v25 = vmax.f32 %v365_v21, 0.0 }
 0x2ab   :  { %v369_v27 = vmax.f32 %v357_v23, 0.0 }
 0x2ac   :  { %v373_v28 = vpack.c.bf16 %v371_v25, %v370_v24 }
 0x2ad   :  { %v372_v29 = vpack.c.bf16 %v369_v27, %v368_v26  ;;  %v975_v26 = vld [vmem:[%s1171_s2 + $0x58] sm:$0xff]   ;;  %v977_v27 = vmov 0.0  }
 0x2af   :  { %916 = vmatprep.subr.bf16.mxu1 %v372_v29 }
 0x2b0   :  { %917 = vmatpush3.bf16.msra.mxu1 %v372_v29  ;;  %v655_v29 = vpop.permute.xlu1 %654 }
 0x2b1   :  { %918 = vmatprep.subr.bf16.mxu1 %v373_v28 }
 0x2b4   :  { %919 = vmatpush3.bf16.msra.mxu1 %v373_v28  ;;  %v650_v28 = vpop.permute.xlu0 %649 }
 0x2b7   :  { %921 = vmatmul.mubr.msk.bf16.vlgmr.msra.gmra.mrb[4].mxu1 %vm221_vm2, %v969_v30 }
 0x2b8   :  { %936 = vmatprep.mubr.msk.bf16.mxu1 %vm221_vm2, %v972_v51  ;;  %v660_v30 = vpop.permute.xlu0 %659 }
 0x38a   :  { %v922_v35 = vpop.f32.mrb[4].mxu1 }
 0x38b   :  { %v453_v36 = vadd.f32 %v922_v35, %v387_v34  ;;  %v444_v37 = vpop.f32.mrb[5].mxu1  ;;  %v665_v34 = vpop.permute.xlu1 %664 }
 0x38c   :  { %v445_v39 = vadd.f32 %v444_v37, %v377_v32  ;;  %v923_v40 = vpop.f32.mrb[6].mxu1 }
 0x38d   :  { %v456_v41 = vadd.f32 %v923_v40, %v392_v38  ;;  %v447_v42 = vpop.f32.mrb[7].mxu1  ;;  %v461_v44 = vmax.f32 %v453_v36, 0.0 }
 0x38e   :  { %v448_v43 = vadd.f32 %v447_v42, %v382_v33  ;;  %v459_v46 = vmax.f32 %v445_v39, 0.0 }
 0x38f   :  { %v462_v45 = vmax.f32 %v456_v41, 0.0 }
 0x390   :  { %v460_v47 = vmax.f32 %v448_v43, 0.0 }
 0x391   :  { %v464_v48 = vpack.c.bf16 %v462_v45, %v461_v44 }
 0x392   :  { %v463_v49 = vpack.c.bf16 %v460_v47, %v459_v46  ;;  %v28_v46 = vld [vmem:[%s1172_s3] sm:$0xf]  ;;  %v741_v47 = vpop.permute.xlu0 %740 }
 0x394   :  { %924 = vmatprep.subr.bf16.mxu0 %v463_v49 }
 0x395   :  { %925 = vmatpush3.bf16.msra.mxu0 %v463_v49 }
 0x396   :  { %926 = vmatprep.subr.bf16.mxu0 %v464_v48 }
 0x399   :  { %927 = vmatpush3.bf16.msra.mxu0 %v464_v48 }
 0x39c   :  { %929 = vmatmul.mubr.msk.bf16.vlgmr.msra.gmra.mrb[8].mxu0 %vm221_vm2, %v971_v50 }
 0x39d   :  { %944 = vmatprep.mubr.msk.bf16.mxu0 %vm221_vm2, %v974_v7 }
 0x46f   :  { %v930_v55 = vpop.f32.mrb[8].mxu0 }
 0x470   :  { %v544_v56 = vadd.f32 %v930_v55, %v478_v54  ;;  %v535_v57 = vpop.f32.mrb[9].mxu0 }
 0x471   :  { %v536_v59 = vadd.f32 %v535_v57, %v468_v52  ;;  %v931_v60 = vpop.f32.mrb[10].mxu0 }
 0x472   :  { %v547_v61 = vadd.f32 %v931_v60, %v483_v58  ;;  %v538_v62 = vpop.f32.mrb[11].mxu0  ;;  %v552_v0 = vmax.f32 %v544_v56, 0.0 }
 0x473   :  { %v539_v63 = vadd.f32 %v538_v62, %v473_v53  ;;  %v550_v2 = vmax.f32 %v536_v59, 0.0 }
 0x474   :  { %v553_v1 = vmax.f32 %v547_v61, 0.0 }
 0x475   :  { %v551_v3 = vmax.f32 %v539_v63, 0.0 }
 0x476   :  { %v555_v4 = vpack.c.bf16 %v553_v1, %v552_v0 }
 0x477   :  { %v554_v5 = vpack.c.bf16 %v551_v3, %v550_v2 }
 0x479   :  { %932 = vmatprep.subr.bf16.mxu1 %v554_v5 }
 0x47a   :  { %933 = vmatpush3.bf16.msra.mxu1 %v554_v5 }
 0x47b   :  { %934 = vmatprep.subr.bf16.mxu1 %v555_v4 }
 0x47e   :  { %935 = vmatpush3.bf16.msra.mxu1 %v555_v4 }
 0x47f   :  { %948 = vmatprep.subr.bf16.mxu1 %v977_v27 }
 0x481   :  { %937 = vmatmul.mubr.msk.bf16.vlgmr.msra.gmra.mrb[8].mxu1 %vm221_vm2, %v973_v6 }
 0x482   :  { %952 = vmatprep.mubr.msk.bf16.mxu1 %vm978_vm3, %v977_v27 }
 0x554   :  { %v938_v11 = vpop.f32.mrb[8].mxu1 }
 0x555   :  { %v635_v12 = vadd.f32 %v938_v11, %v569_v10  ;;  %v626_v13 = vpop.f32.mrb[9].mxu1 }
 0x556   :  { %v627_v15 = vadd.f32 %v626_v13, %v559_v8  ;;  %v939_v16 = vpop.f32.mrb[10].mxu1 }
 0x557   :  { %v638_v17 = vadd.f32 %v939_v16, %v574_v14  ;;  %v629_v18 = vpop.f32.mrb[11].mxu1  ;;  %v643_v20 = vmax.f32 %v635_v12, 0.0 }
 0x558   :  { %v630_v19 = vadd.f32 %v629_v18, %v564_v9  ;;  %v641_v22 = vmax.f32 %v627_v15, 0.0 }
 0x559   :  { %v644_v21 = vmax.f32 %v638_v17, 0.0 }
 0x55a   :  { %v642_v23 = vmax.f32 %v630_v19, 0.0 }
 0x55b   :  { %v646_v24 = vpack.c.bf16 %v644_v21, %v643_v20 }
 0x55c   :  { %v645_v25 = vpack.c.bf16 %v642_v23, %v641_v22 }
 0x55e   :  { %940 = vmatprep.subr.bf16.mxu0 %v645_v25 }
 0x55f   :  { %941 = vmatpush3.bf16.msra.mxu0 %v645_v25 }
 0x560   :  { %942 = vmatprep.subr.bf16.mxu0 %v646_v24 }
 0x563   :  { %943 = vmatpush3.bf16.msra.mxu0 %v646_v24 }
 0x566   :  { %945 = vmatmul.mubr.msk.bf16.vlgmr.msra.gmra.mrb[12].mxu0 %vm221_vm2, %v975_v26 }
 0x639   :  { %v946_v31 = vpop.f32.mrb[12].mxu0 }
 0x63a   :  { %v726_v32 = vadd.f32 %v946_v31, %v660_v30  ;;  %v717_v33 = vpop.f32.mrb[13].mxu0 }
 0x63b   :  { %v718_v35 = vadd.f32 %v717_v33, %v650_v28  ;;  %v947_v36 = vpop.f32.mrb[14].mxu0 }
 0x63c   :  { %v729_v37 = vadd.f32 %v947_v36, %v665_v34  ;;  %v720_v38 = vpop.f32.mrb[15].mxu0  ;;  %v734_v40 = vmax.f32 %v726_v32, 0.0 }
 0x63d   :  { %v721_v39 = vadd.f32 %v720_v38, %v655_v29  ;;  %v732_v42 = vmax.f32 %v718_v35, 0.0 }
 0x63e   :  { %v735_v41 = vmax.f32 %v729_v37, 0.0 }
 0x63f   :  { %v733_v43 = vmax.f32 %v721_v39, 0.0 }
 0x640   :  { %v737_v44 = vpack.c.bf16 %v735_v41, %v734_v40 }
 0x641   :  { %v736_v45 = vpack.c.bf16 %v733_v43, %v732_v42 }
 0x643   :  { %949 = vmatpush3.bf16.msra.mxu1 %v736_v45 }
 0x644   :  { %950 = vmatprep.subr.bf16.mxu1 %v977_v27 }
 0x647   :  { %951 = vmatpush3.bf16.msra.mxu1 %v737_v44 }
 0x64a   :  { %953 = vmatmul.mubr.msk.bf16.vlgmr.msra.gmra.mrb[12].mxu1 %vm221_vm2, %v28_v46 }
 0x71d   :  { %v780_v48 = vpop.f32.mrb[12].mxu1 }
 0x71e   :  { %v781_v49 = vadd.f32 %v780_v48, %v741_v47  ;;  %v954_v50 = vpop.f32.mrb[13].mxu1 }
 0x71f   :  { %v783_v51 = vpop.f32.mrb[14].mxu1 }
 0x720   :  { %786 = vst [vmem:[%s1173_s6] sm:$0xff] %v781_v49  ;;  %v955_v52 = vpop.f32.mrb[15].mxu1 }

</bundles_post_ra>
